<compile_context>
chip_gen: v5e
topology: v5e:2x2
jax: 0.10.0
libtpu: 0.0.40
codegen_flags: <defaults>
</compile_context>

<pallas_src>
from typing import Any, Dict, Optional, Tuple

import jax
import jax.numpy as jnp
from jax.experimental import pallas as pl
from jax.experimental.pallas import tpu as pltpu


def _round_up(x: int, m: int) -> int:
    return ((x + m - 1) // m) * m


# ---------------------------------------------------------------------------
# Pallas kernel: tiled output projection (bf16 MXU, f32 acc) + online logsumexp
# ---------------------------------------------------------------------------
def _output_layer_kernel(x_ref, w_ref, b_ref, logits_ref, lse_ref, m_sc, l_sc):
    # x_ref:      (tm, E)  bf16 feature tile (same block for every vocab tile)
    # w_ref:      (E, tn)  bf16 weight tile for the current vocab tile
    # b_ref:      (1, tn)  f32 bias tile (-1e30 in padded vocab columns)
    # logits_ref: (tm, tn) f32 output tile (lane-dense, written every step)
    # lse_ref:    (tm, 1)  f32 per-row logsumexp (resident across vocab tiles)
    # m_sc, l_sc: (tm, 1)  f32 running max / running sum scratch
    j = pl.program_id(1)

    @pl.when(j == 0)
    def _init():
        m_sc[...] = jnp.full(m_sc.shape, -jnp.inf, dtype=m_sc.dtype)
        l_sc[...] = jnp.zeros(l_sc.shape, dtype=l_sc.dtype)

    logits = (
        jnp.dot(x_ref[...], w_ref[...], preferred_element_type=jnp.float32)
        + b_ref[...]
    )
    logits_ref[...] = logits

    # Online (flash-style) logsumexp across the vocab tiles.
    m_prev = m_sc[...]
    m_new = jnp.maximum(m_prev, jnp.max(logits, axis=-1, keepdims=True))
    alpha = jnp.exp(m_prev - m_new)
    l_sc[...] = alpha * l_sc[...] + jnp.sum(
        jnp.exp(logits - m_new), axis=-1, keepdims=True
    )
    m_sc[...] = m_new

    @pl.when(j == pl.num_programs(1) - 1)
    def _finalize():
        lse_ref[...] = m_sc[...] + jnp.log(l_sc[...])


def _pallas_output_layer(features_2d, weight, bias, *, tile_m=256, tile_n=2048):
    """features_2d: (M, E); weight: (E, V); bias: (V,).

    Returns (logits (M, V) f32, lse (M, 1) f32) with lse = logsumexp(logits, -1).
    """
    M, E = features_2d.shape
    V = weight.shape[1]

    # 8-/128-aligned tiles; shrink to the (padded) problem size when smaller.
    tile_m = max(8, _round_up(tile_m, 8))
    tile_n = max(128, _round_up(tile_n, 128))
    tm = min(tile_m, _round_up(M, 8))
    tn = min(tile_n, _round_up(V, 128))
    m_pad = _round_up(M, tm)
    v_pad = _round_up(V, tn)

    # bf16 into the MXU (halves DMA bytes / VMEM); f32 accumulation in-kernel.
    x = features_2d.astype(jnp.bfloat16)
    w = weight.astype(jnp.bfloat16)
    b = bias.astype(jnp.float32).reshape(1, V)
    if m_pad != M:
        x = jnp.pad(x, ((0, m_pad - M), (0, 0)))
    if v_pad != V:
        w = jnp.pad(w, ((0, 0), (0, v_pad - V)))
        # Padded vocab columns get a huge negative bias so exp() == 0 in the lse.
        b = jnp.pad(b, ((0, 0), (0, v_pad - V)), constant_values=-1e30)

    grid = (m_pad // tm, v_pad // tn)

    logits, lse = pl.pallas_call(
        _output_layer_kernel,
        out_shape=(
            jax.ShapeDtypeStruct((m_pad, v_pad), jnp.float32),
            jax.ShapeDtypeStruct((m_pad, 1), jnp.float32),
        ),
        grid_spec=pltpu.PrefetchScalarGridSpec(
            num_scalar_prefetch=0,
            grid=grid,
            in_specs=[
                pl.BlockSpec((tm, E), lambda i, j: (i, 0)),
                pl.BlockSpec((E, tn), lambda i, j: (0, j)),
                pl.BlockSpec((1, tn), lambda i, j: (0, j)),
            ],
            out_specs=[
                pl.BlockSpec((tm, tn), lambda i, j: (i, j)),
                # Same block across the vocab axis -> VMEM-resident accumulator,
                # written back once per row tile (finalized on the last V tile).
                pl.BlockSpec((tm, 1), lambda i, j: (i, 0)),
            ],
            scratch_shapes=[
                pltpu.VMEM((tm, 1), jnp.float32),  # running max
                pltpu.VMEM((tm, 1), jnp.float32),  # running sum
            ],
        ),
        compiler_params=pltpu.CompilerParams(
            # Row tiles are independent (megacore-shardable on v7x); the vocab
            # axis carries the lse accumulator so it must stay "arbitrary".
            dimension_semantics=("parallel", "arbitrary"),
        ),
    )(x, w, b)

    return logits[:M, :V], lse[:M, :]


# ---------------------------------------------------------------------------
# JAX-side module mirroring FairseqIncrementalDecoder's forward semantics
# ---------------------------------------------------------------------------
class FairseqIncrementalDecoderPallas:
    """Minimal concrete FairseqIncrementalDecoder with a Pallas output layer.

    forward(prev_output_tokens[, incremental_state]) -> (logits (B,T,V), extra),
    matching FairseqDecoder.forward = output_layer(extract_features(...)).
    get_normalized_probs(..., log_probs=...) applies (log_)softmax over vocab,
    reconstructed from the kernel's fused per-row logsumexp.
    """

    def __init__(self, vocab_size: int, embed_dim: int, key, *,
                 tile_m: int = 256, tile_n: int = 2048):
        self.vocab_size = vocab_size
        self.embed_dim = embed_dim
        self.tile_m = tile_m
        self.tile_n = tile_n
        k_emb, k_w, k_b = jax.random.split(key, 3)
        # Deterministic synthetic parameters (shapes implied by the module).
        self.embed_tokens = (
            jax.random.normal(k_emb, (vocab_size, embed_dim), jnp.float32) * 0.02
        )
        self.out_weight = (
            jax.random.normal(k_w, (embed_dim, vocab_size), jnp.float32) * 0.02
        )
        self.out_bias = jax.random.normal(k_b, (vocab_size,), jnp.float32) * 0.01

    def extract_features(
        self,
        prev_output_tokens,
        encoder_out=None,
        incremental_state: Optional[Dict[str, Dict[str, Any]]] = None,
    ):
        # Incremental decoding: only the newest timestep is fed forward.
        if incremental_state is not None:
            prev_output_tokens = prev_output_tokens[:, -1:]
        # TODO(synk): the embedding gather could be fused into the kernel via
        # PrefetchScalarGridSpec(num_scalar_prefetch=1) + a pl.Element row
        # gather on embed_tokens; kept as plain-JAX glue here.
        feats = jnp.take(self.embed_tokens, prev_output_tokens, axis=0)
        return feats, {"attn": None, "inner_states": [feats]}

    def output_layer(self, features):
        B, T, E = features.shape
        logits2d, lse2d = _pallas_output_layer(
            features.reshape(B * T, E),
            self.out_weight,
            self.out_bias,
            tile_m=self.tile_m,
            tile_n=self.tile_n,
        )
        return (
            logits2d.reshape(B, T, self.vocab_size),
            lse2d.reshape(B, T, 1),
        )

    def forward(
        self,
        prev_output_tokens,
        encoder_out=None,
        incremental_state: Optional[Dict[str, Dict[str, Any]]] = None,
    ) -> Tuple[jnp.ndarray, Dict[str, Any]]:
        feats, extra = self.extract_features(
            prev_output_tokens, encoder_out, incremental_state
        )
        logits, lse = self.output_layer(feats)
        extra["lse"] = lse  # fused per-row logsumexp from the Pallas kernel
        return logits, extra

    def get_normalized_probs(self, net_output, log_probs: bool, sample=None):
        logits, extra = net_output
        lse = extra.get("lse") if isinstance(extra, dict) else None
        if lse is None:
            logp = jax.nn.log_softmax(logits, axis=-1)
        else:
            logp = logits - lse  # log_softmax via the kernel's fused logsumexp
        return logp if log_probs else jnp.exp(logp)

    # TODO(synk): reorder_incremental_state / set_beam_size are pure Python
    # dict bookkeeping with no tensor compute -> no Pallas kernel needed.
    def reorder_incremental_state(self, incremental_state, new_order):
        pass


if __name__ == "__main__":
    key = jax.random.PRNGKey(0)
    k_params, k_tokens = jax.random.split(key)

    # Small demo shapes; tile_n=128 so the vocab axis is genuinely tiled
    # (V=320 -> padded to 384 -> 3 vocab tiles, last one partially masked).
    batch, tgt_len = 2, 8
    vocab_size, embed_dim = 320, 64

    decoder = FairseqIncrementalDecoderPallas(
        vocab_size, embed_dim, k_params, tile_m=256, tile_n=128
    )
    prev_output_tokens = jax.random.randint(
        k_tokens, (batch, tgt_len), 0, vocab_size, dtype=jnp.int32
    )

    # Full teacher-forcing forward (exercises M/V tiling + vocab padding).
    logits, extra = decoder.forward(prev_output_tokens)
    log_probs = decoder.get_normalized_probs((logits, extra), log_probs=True)
    probs = decoder.get_normalized_probs((logits, extra), log_probs=False)
    jax.block_until_ready(logits)
    jax.block_until_ready(log_probs)

    # Reference in plain JAX with the same bf16 MXU inputs / f32 accumulation.
    feats = jnp.take(decoder.embed_tokens, prev_output_tokens, axis=0)
    ref_logits = (
        jnp.dot(
            feats.reshape(-1, embed_dim).astype(jnp.bfloat16),
            decoder.out_weight.astype(jnp.bfloat16),
            preferred_element_type=jnp.float32,
        )
        + decoder.out_bias
    ).reshape(batch, tgt_len, vocab_size)

    assert logits.shape == (batch, tgt_len, vocab_size)
    assert jnp.allclose(logits, ref_logits, atol=1e-3, rtol=1e-3)
    # The fused online lse must match a direct log_softmax of the same logits.
    assert jnp.allclose(
        log_probs, jax.nn.log_softmax(logits, axis=-1), atol=1e-4, rtol=1e-4
    )
    assert jnp.allclose(jnp.sum(probs, axis=-1), 1.0, atol=1e-3)

    # Incremental decode step: T=1, M=batch=2 (not a tile multiple -> padding).
    incremental_state: Dict[str, Dict[str, Any]] = {}
    logits_inc, extra_inc = decoder.forward(
        prev_output_tokens, incremental_state=incremental_state
    )
    log_probs_inc = decoder.get_normalized_probs(
        (logits_inc, extra_inc), log_probs=True
    )
    jax.block_until_ready(logits_inc)
    assert logits_inc.shape == (batch, 1, vocab_size)
    assert jnp.allclose(
        log_probs_inc, jax.nn.log_softmax(logits_inc, axis=-1), atol=1e-4
    )

    print("KERNEL_OK")
</pallas_src>

<mosaic_0001>
module attributes {stable_mosaic.version = 11 : i64} {
  func.func @_output_layer_kernel(%arg0: i32, %arg1: i32, %arg2: memref<16x64xbf16, #tpu.memory_space<vmem>>, %arg3: memref<64x128xbf16, #tpu.memory_space<vmem>>, %arg4: memref<1x128xf32, #tpu.memory_space<vmem>>, %arg5: memref<16x128xf32, #tpu.memory_space<vmem>>, %arg6: memref<16x1xf32, #tpu.memory_space<vmem>>, %arg7: memref<16x1xf32, #tpu.memory_space<vmem>>, %arg8: memref<16x1xf32, #tpu.memory_space<vmem>>) attributes {dimension_semantics = [#tpu.dimension_semantics<parallel>, #tpu.dimension_semantics<arbitrary>], iteration_bounds = array<i64: 1, 3>, scalar_prefetch = 0 : i64, scratch_operands = 2 : i64, tpu.core_type = #tpu.core_type<tc>, window_params = [{transform_indices = @transform_0, window_bounds = array<i64: 16, 64>}, {transform_indices = @transform_1, window_bounds = array<i64: 64, 128>}, {transform_indices = @transform_2, window_bounds = array<i64: 1, 128>}, {transform_indices = @transform_3, window_bounds = array<i64: 16, 128>}, {transform_indices = @transform_4, window_bounds = array<i64: 16, 1>}]} {
    %c0_i32 = arith.constant 0 : i32
    %0 = arith.cmpi eq, %arg1, %c0_i32 : i32
    %1 = arith.extui %0 : i1 to i32
    %c0_i32_0 = arith.constant 0 : i32
    %2 = arith.cmpi ne, %1, %c0_i32_0 : i32
    scf.if %2 {
      %cst_19 = arith.constant 0xFF800000 : f32
      %29 = vector.broadcast %cst_19 : f32 to vector<16x1xf32>
      %c0_20 = arith.constant 0 : index
      %c0_21 = arith.constant 0 : index
      %30 = vector.load %arg7[%c0_20, %c0_21] : memref<16x1xf32, #tpu.memory_space<vmem>>, vector<16x1xf32>
      tpu.vector_store %arg7[%c0_20, %c0_21], %29 {strides = array<i32>} : memref<16x1xf32, #tpu.memory_space<vmem>>, vector<16x1xf32>,
      %cst_22 = arith.constant 0.000000e+00 : f32
      %31 = vector.broadcast %cst_22 : f32 to vector<16x1xf32>
      %c0_23 = arith.constant 0 : index
      %c0_24 = arith.constant 0 : index
      %32 = vector.load %arg8[%c0_23, %c0_24] : memref<16x1xf32, #tpu.memory_space<vmem>>, vector<16x1xf32>
      tpu.vector_store %arg8[%c0_23, %c0_24], %31 {strides = array<i32>} : memref<16x1xf32, #tpu.memory_space<vmem>>, vector<16x1xf32>,
    } else {
    }
    %c0 = arith.constant 0 : index
    %c0_1 = arith.constant 0 : index
    %3 = vector.load %arg2[%c0, %c0_1] : memref<16x64xbf16, #tpu.memory_space<vmem>>, vector<16x64xbf16>
    %c0_2 = arith.constant 0 : index
    %c0_3 = arith.constant 0 : index
    %4 = vector.load %arg3[%c0_2, %c0_3] : memref<64x128xbf16, #tpu.memory_space<vmem>>, vector<64x128xbf16>
    %cst = arith.constant dense<0.000000e+00> : vector<16x128xf32>
    %5 = tpu.matmul %3, %4, %cst {dimension_numbers = #tpu.dot_dimension_numbers<[1], [0], [0], [1], [0, 0, 1, 1], [], []>} : vector<16x64xbf16>, vector<64x128xbf16>, vector<16x128xf32> -> vector<16x128xf32>
    %c0_4 = arith.constant 0 : index
    %c0_5 = arith.constant 0 : index
    %6 = vector.load %arg4[%c0_4, %c0_5] : memref<1x128xf32, #tpu.memory_space<vmem>>, vector<1x128xf32>
    %7 = vector.broadcast %6 : vector<1x128xf32> to vector<16x128xf32>
    %8 = arith.addf %5, %7 : vector<16x128xf32>
    %c0_6 = arith.constant 0 : index
    %c0_7 = arith.constant 0 : index
    %9 = vector.load %arg5[%c0_6, %c0_7] : memref<16x128xf32, #tpu.memory_space<vmem>>, vector<16x128xf32>
    tpu.vector_store %arg5[%c0_6, %c0_7], %8 {strides = array<i32>} : memref<16x128xf32, #tpu.memory_space<vmem>>, vector<16x128xf32>,
    %c0_8 = arith.constant 0 : index
    %c0_9 = arith.constant 0 : index
    %10 = vector.load %arg7[%c0_8, %c0_9] : memref<16x1xf32, #tpu.memory_space<vmem>>, vector<16x1xf32>
    %cst_10 = arith.constant dense<0xFF800000> : vector<16xf32>
    %11 = vector.multi_reduction <maximumf>, %8, %cst_10 [1] : vector<16x128xf32> to vector<16xf32>
    %12 = vector.shape_cast %11 : vector<16xf32> to vector<16x1xf32>
    %13 = arith.maximumf %10, %12 : vector<16x1xf32>
    %14 = arith.subf %10, %13 : vector<16x1xf32>
    %15 = math.exp %14 : vector<16x1xf32>
    %c0_11 = arith.constant 0 : index
    %c0_12 = arith.constant 0 : index
    %16 = vector.load %arg8[%c0_11, %c0_12] : memref<16x1xf32, #tpu.memory_space<vmem>>, vector<16x1xf32>
    %17 = arith.mulf %15, %16 : vector<16x1xf32>
    %18 = vector.broadcast %13 : vector<16x1xf32> to vector<16x128xf32>
    %19 = arith.subf %8, %18 : vector<16x128xf32>
    %20 = math.exp %19 : vector<16x128xf32>
    %cst_13 = arith.constant dense<0.000000e+00> : vector<16xf32>
    %21 = vector.multi_reduction <add>, %20, %cst_13 [1] : vector<16x128xf32> to vector<16xf32>
    %22 = vector.shape_cast %21 : vector<16xf32> to vector<16x1xf32>
    %23 = arith.addf %17, %22 : vector<16x1xf32>
    %c0_14 = arith.constant 0 : index
    %c0_15 = arith.constant 0 : index
    %24 = vector.load %arg8[%c0_14, %c0_15] : memref<16x1xf32, #tpu.memory_space<vmem>>, vector<16x1xf32>
    tpu.vector_store %arg8[%c0_14, %c0_15], %23 {strides = array<i32>} : memref<16x1xf32, #tpu.memory_space<vmem>>, vector<16x1xf32>,
    %c0_16 = arith.constant 0 : index
    %c0_17 = arith.constant 0 : index
    %25 = vector.load %arg7[%c0_16, %c0_17] : memref<16x1xf32, #tpu.memory_space<vmem>>, vector<16x1xf32>
    tpu.vector_store %arg7[%c0_16, %c0_17], %13 {strides = array<i32>} : memref<16x1xf32, #tpu.memory_space<vmem>>, vector<16x1xf32>,
    %c2_i32 = arith.constant 2 : i32
    %26 = arith.cmpi eq, %arg1, %c2_i32 : i32
    %27 = arith.extui %26 : i1 to i32
    %c0_i32_18 = arith.constant 0 : i32
    %28 = arith.cmpi ne, %27, %c0_i32_18 : i32
    scf.if %28 {
      %c0_19 = arith.constant 0 : index
      %c0_20 = arith.constant 0 : index
      %29 = vector.load %arg7[%c0_19, %c0_20] : memref<16x1xf32, #tpu.memory_space<vmem>>, vector<16x1xf32>
      %c0_21 = arith.constant 0 : index
      %c0_22 = arith.constant 0 : index
      %30 = vector.load %arg8[%c0_21, %c0_22] : memref<16x1xf32, #tpu.memory_space<vmem>>, vector<16x1xf32>
      %31 = math.log %30 : vector<16x1xf32>
      %32 = arith.addf %29, %31 : vector<16x1xf32>
      %c0_23 = arith.constant 0 : index
      %c0_24 = arith.constant 0 : index
      %33 = vector.load %arg6[%c0_23, %c0_24] : memref<16x1xf32, #tpu.memory_space<vmem>>, vector<16x1xf32>
      tpu.vector_store %arg6[%c0_23, %c0_24], %32 {strides = array<i32>} : memref<16x1xf32, #tpu.memory_space<vmem>>, vector<16x1xf32>,
    } else {
    }
    return
  }
  func.func @transform_0(%arg0: i32, %arg1: i32) -> (i32, i32) {
    %c0_i32 = arith.constant 0 : i32
    %c0_i32_0 = arith.constant 0 : i32
    return %arg0, %c0_i32 : i32, i32
  }
  func.func @transform_1(%arg0: i32, %arg1: i32) -> (i32, i32) {
    %c0_i32 = arith.constant 0 : i32
    %c0_i32_0 = arith.constant 0 : i32
    return %c0_i32, %arg1 : i32, i32
  }
  func.func @transform_2(%arg0: i32, %arg1: i32) -> (i32, i32) {
    %c0_i32 = arith.constant 0 : i32
    %c0_i32_0 = arith.constant 0 : i32
    return %c0_i32, %arg1 : i32, i32
  }
  func.func @transform_3(%arg0: i32, %arg1: i32) -> (i32, i32) {
    %c0_i32 = arith.constant 0 : i32
    return %arg0, %arg1 : i32, i32
  }
  func.func @transform_4(%arg0: i32, %arg1: i32) -> (i32, i32) {
    %c0_i32 = arith.constant 0 : i32
    %c0_i32_0 = arith.constant 0 : i32
    return %arg0, %c0_i32 : i32, i32
  }
}

</mosaic_0001>

<bundles_post_ra>
// kernel: tpu_custom_call.1
= control target key start
LH: loop header
LB: loop body
LE: loop exit
PB: predicated region body
PF: predicated region fallthrough
CT: control target
= control target key end

     0   :  { %s1154_s0 = inlined_call_operand.hbm [shape: bf16[16,64], index: 0, kind: input, shape index: {}]   ;;  %s1155_s1 = inlined_call_operand.hbm [shape: bf16[64,384], index: 1, kind: input, shape index: {}]   ;;  %s1156_s2 = inlined_call_operand.hbm [shape: f32[1,384], index: 2, kind: input, shape index: {}]   ;;  %s1157_s3 = inlined_call_operand.hbm [shape: f32[16,384], index: 3, kind: output, shape index: {0}]   ;;  %s1158_s4 = inlined_call_operand.vmem [shape: f32[16,1], index: 4, kind: output, shape index: {1}]  }
   0x1   :  { %1160 = sst [smem:[#allocation14_spill]] %s1154_s0 }
   0x2   :  { %10 = vsyncpa [#allocation5], 0 }
   0x3   :  { %11 = vsyncpa [#allocation8], 0 }
   0x4   :  { %13 = vsyncpa [#allocation8 + $0x1], 0 }
   0x5   :  { %14 = vsyncpa [#allocation6], 0 }
   0x6   :  { %16 = vsyncpa [#allocation6 + $0x1], 0  ;;  %s960_s15 = smov 0   ;;  %s962_s16 = smov 0  }
   0x7   :  { %s964_s17 = smov 0   ;;  %s966_s18 = smov 0  }
   0x8   :  { %s968_s19 = smov 0   ;;  %s970_s20 = smov 0  }
   0x9 LB: > { %s31_s21 = sadd.s32 1, %s919_s19  ;;  %s67_s22 = sadd.s32 1, %s911_s17  ;;  %s923_s20 = sphi %s970_s20, %s22_s20   ;;  %s919_s19 = sphi %s968_s19, %s1173_s19   ;;  %s915_s18 = sphi %s966_s18, %s1172_s18   ;;  %s911_s17 = sphi %s964_s17, %s1171_s17   ;;  %s907_s16 = sphi %s962_s16, %s1170_s16   ;;  %s903_s15 = sphi %s960_s15, %s1169_s15  }
   0xa   : > { %p32_p0 = scmp.ge.s32.totalorder %s31_s21, 3  ;;  %p74_p1 = scmp.ne.s32.totalorder %s911_s17, %s907_s16 }
   0xb   : > { %p75_p2 = scmp.eq.s32.totalorder %s923_s20, 0  ;;  %p671_p5 = scmp.lt.s32.totalorder %s923_s20, 3 }
   0xc   : > { %s1175_s21 = smov (%p32_p0, %s31_s21), 0  ;;  %s201_s25 = sand.u32 1, %s923_s20  }
   0xd   : > { %p1000_p3 = por %p75_p2, %p74_p1  ;;  %s64_s24 = ssub.s32 %s919_s19, %s1175_s21 }
   0xe   : > { %p65_p4 = scmp.eq.s32.totalorder %s64_s24, 0  ;;  %s203_s26 = sand.u32 1, %s911_s17  }
   0xf   : > { %s605_s28 = sshll.u32 %s203_s26, 5  ;;  %s606_s29 = sshll.u32 %s919_s19, 2 }
  0x10   : > { %s1010_s27 = scalar_select %p65_p4, %s911_s17, %s67_s22  }
  0x11   : > { %s209_s6 = scalar_lea.hbm %s1155_s1, %s606_s29  ;;  %s205_s7 = scalar_lea.vmem [#allocation7], %s605_s28 }
  0x12   : > { %s212_s8 = sshll.u32 %s205_s7, 4  ;;  %s210_s9 = sshll.u32 %s209_s6, 4  ;;  %s213_s8 = int_to_ptr.vmem [resolvable:$true] %s212_s8  ;;  %s211_s9 = int_to_ptr.hbm [resolvable:$true] %s210_s9 }
  0x13   : > { %p1020_p6 = pnand %p671_p5, %p1000_p3  ;;  %s1024_s11 = scalar_lea.sflag [#allocation8], %s201_s25 }
  0x14   : > { %s925_s12 = smov 192   ;;  %s1159_s13 = smov 64  }
  0x15   : > { %s927_s14 = smov 4   ;;  %s1032_s22 = sadd.s32 4294967295, %s923_s20  }
  0x16   : > { %662 = dma.hbm_to_vmem [thread:$0]  (!%p1020_p6), %s211_s9, 512, %s213_s8, %s1024_s11, %s925_s12, %s1159_s13, %s927_s14  }
  0x17   : > { %s601_s23 = sadd.s32 4294967294, %s923_s20   ;;  %p80_p7 = scmp.ne.s32.totalorder %s907_s16, %s903_s15 }
  0x18   : > { %p81_p8 = scmp.eq.s32.totalorder %s1032_s22, 0  ;;  %p132_p9 = scmp.eq.s32.totalorder %s1032_s22, 2 }
  0x19   : > { %p138_p10 = scmp.eq.s32.totalorder %s601_s23, 2  ;;  %p602_p12 = scmp.ge.s32.totalorder %s923_s20, 1 }
  0x1a   : > { %p1041_p11 = por %p81_p8, %p80_p7  ;;  %p1049_p13 = por %p132_p9, %p74_p1 }
  0x1b   : > { %p1053_p0 = por %p138_p10, %p80_p7  ;;  %p171_p2 = scmp.lt.s32.totalorder %s923_s20, 4 }
  0x1c   : > { %s1166_s0 = sld [smem:[#allocation14_spill]]  ;;  %s928_s7 = smov [#allocation4]  }
  0x1d   : > { %p1061_p3 = pnand %p602_p12, %p171_p2  ;;  %s187_s8 = sshll.u32 %s928_s7, 4  ;;  %s188_s8 = int_to_ptr.vmem [resolvable:$true] %s187_s8 }
  0x1e   : > { %s228_s23 = scalar_lea.hbm %s1156_s2, %s919_s19  ;;  %s225_s29 = scalar_lea.vmem [#allocation9], %s203_s26 }
  0x1f   : > { %p655_p1 = pneg %p1061_p3  ;;  %s232_s30 = sshll.u32 %s225_s29, 4  ;;  %s233_s30 = int_to_ptr.vmem [resolvable:$true] %s232_s30 }
  0x20   : > { %s230_s13 = sshll.u32 %s228_s23, 4  ;;  %241 = sbr.rel (%p1061_p3) target bundleno = 606 (0x25e), region = 32  ;;  %s231_s13 = int_to_ptr.hbm [resolvable:$true] %s230_s13 }
  0x21   : > { %p656_p4 = pnand %p655_p1, %p81_p8 }
  0x22   : > { %s185_s5 = sshll.u32 %s1166_s0, 4  ;;  %s1168_s0 = smov 64   ;;  %s186_s5 = int_to_ptr.hbm [resolvable:$true] %s185_s5 }
  0x23   : > { %658 = dma.hbm_to_vmem [thread:$0]  (!%p656_p4), %s186_s5, 128, %s188_s8, [#allocation5], %s1168_s0, %s1168_s0, %s927_s14  }
  0x24   : > { %665 = dma.hbm_to_vmem [thread:$0]  (!%p1020_p6), %s231_s13, 16, %s233_s30, %s1024_s11  }
  0x25   : > { %890 = dma.done.wait (%p81_p8), [#allocation5], 128  }
  0x26   : > { %892 = vsyncadd (%p81_p8), [#allocation5], 4294967168  ;;  %s248_s26 = sand.u32 1, %s1032_s22   ;;  %s1089_s7 = sand.u32 1, %s907_s16  }
  0x27   : > { %s609_s9 = sshll.u32 %s1089_s7, 5  ;;  %s249_s0 = scalar_lea.sflag [#allocation8], %s248_s26 }
  0x28   : > { %s252_s10 = scalar_lea.vmem [#allocation7], %s609_s9 }
  0x29   : > { %894 = dma.done.wait (%p1041_p11), %s249_s0, 528  }
  0x2a   : > { %896 = vsyncadd (%p1041_p11), %s249_s0, 4294966768  ;;  %s610_s11 = sshll.u32 %s1089_s7, 4  ;;  %s261_s13 = scalar_lea.vmem [#allocation9], %s1089_s7 }
  0x2b   : > { %s1098_s14 = scalar_lea.vmem [#allocation10], %s610_s11  ;;  %p611_p5 = scmp.ne.s32.totalorder %s915_s18, 0 }
  0x2d   : > { %308 = sbr.rel (%p611_p5) target bundleno = 55 (0x37), region = 48 }
  0x32   : > { %vm309_vm0 = vcmask 7168   ;;  %v929_v0 = vmov -inf   ;;  %v930_v1 = vmov 0.0  }
  0x33   : > { %310 = vst.msk [vmem:[#allocation2] sm:$0xff] %vm309_vm0, %v929_v0 }
  0x34   : > { %311 = vst.msk [vmem:[#allocation2 + $0x8] sm:$0xff] %vm309_vm0, %v929_v0 }
  0x35   : > { %312 = vst.msk [vmem:[#allocation3] sm:$0xff] %vm309_vm0, %v930_v1 }
  0x36   : > { %313 = vst.msk [vmem:[#allocation3 + $0x8] sm:$0xff] %vm309_vm0, %v930_v1 }
  0x37 PF: > { %v644_v2 = vld [vmem:[%s252_s10 + $0x18] sm:$0xff]  ;;  %v643_v3 = vld [vmem:[%s252_s10 + $0x10] sm:$0xff]  ;;  %v642_v4 = vld [vmem:[%s252_s10 + $0x8] sm:$0xff]  ;;  %vm357_vm1 = vcmask 523264   ;;  %v931_v12 = vmov 0   ;;  %vm417_vm2 = vcmask 7168  }
  0x38   : > { %365 = vmatpush.bf16.msra.mxu0 %v644_v2  ;;  %v641_v5 = vld [vmem:[%s252_s10] sm:$0xff]  ;;  %v640_v6 = vld [vmem:[#allocation4] sm:$0xff]  ;;  %732 = vset.pattern.permute.xlu1 %v931_v12  ;;  %p633_p6 = scmp.ne.s32.totalorder %s915_s18, 2 }
  0x39   : > { %v734_v7 = vld [vmem:[%s261_s13] ss:$0 sm:$0xff]  ;;  %733 = vset.pattern.permute.xlu0 %v931_v12 }
  0x3a   : > { %v377_v13 = vld [vmem:[#allocation2] sm:$0xff] }
  0x3b   : > { %v378_v17 = vld [vmem:[#allocation2 + $0x8] sm:$0xff] }
  0x3c   : > { %366 = vmatpush.bf16.msra.mxu0 %v643_v3  ;;  %v391_v32 = vld [vmem:[#allocation3] sm:$0xff] }
  0x3d   : > { %v392_v37 = vld [vmem:[#allocation3 + $0x8] sm:$0xff] }
  0x40   : > { %367 = vmatpush.bf16.msra.mxu0 %v642_v4 }
  0x44   : > { %368 = vmatpush.bf16.msra.mxu0 %v641_v5 }
  0x47   : > { %632 = vmatmul.msk.bf16.vlgmr.msra.gmra.mxu0 %vm357_vm1, %v640_v6 }
  0xc4   : > { %v370_v8 = vpop.f32.mrf.mxu0 }
  0xc5   : > { %v371_v9 = vadd.f32 %v734_v7, %v370_v8 }
  0xc7   : > { %375 = vst [vmem:[%s1098_s14] sm:$0xff] %v371_v9  ;;  %379 = vmax.xlane.f32.xlu0 %v371_v9 }
  0xcc   : > { %v372_v10 = vpop.f32.mrf.mxu0 }
  0xcd   : > { %v373_v11 = vadd.f32 %v734_v7, %v372_v10 }
  0xcf   : > { %376 = vst [vmem:[%s1098_s14 + $0x8] sm:$0xff] %v373_v11  ;;  %381 = vmax.xlane.f32.xlu0 %v373_v11 }
 0x13a   : > { %v380_v14 = vpop.xlane.xlu0 %379 }
 0x13b   : > { %v383_v15 = vmax.f32 %v377_v13, %v380_v14 }
 0x13d   : > { %v385_v16 = vsub.f32 %v377_v13, %v383_v15  ;;  %420 = vst.msk [vmem:[#allocation2] sm:$0xff] %vm417_vm2, %v383_v15  ;;  %397 = vperm.xlu1 %732, %v383_v15  }
 0x13f   : > { %v387_v29 = vmul.f32 1.442695, %v385_v16 }
 0x142   : > { %v382_v18 = vpop.xlane.xlu0 %381 }
 0x143   : > { %v384_v19 = vmax.f32 %v378_v17, %v382_v18 }
 0x145   : > { %v386_v20 = vsub.f32 %v378_v17, %v384_v19  ;;  %421 = vst.msk [vmem:[#allocation2 + $0x8] sm:$0xff] %vm417_vm2, %v384_v19  ;;  %402 = vperm.xlu1 %732, %v384_v19  }
 0x147   : > { %v389_v30 = vmul.f32 1.442695, %v386_v20 }
 0x1af   : > { %v398_v21 = vpop.permute.xlu1 %397 }
 0x1b0   : > { %v405_v22 = vsub.f32 %v371_v9, %v398_v21 }
 0x1b2   : > { %v407_v23 = vmul.f32 1.442695, %v405_v22 }
 0x1b4   : > { %735 = vpow2.f32 %v407_v23 }
 0x1b7   : > { %v403_v24 = vpop.permute.xlu1 %402 }
 0x1b8   : > { %v406_v25 = vsub.f32 %v373_v11, %v403_v24 }
 0x1ba   : > { %v736_v26 = vpop.eup %735  ;;  %v409_v27 = vmul.f32 1.442695, %v406_v25 }
 0x1bb   : > { %411 = vadd.xlane.f32.xlu2 %v736_v26 }
 0x1bc   : > { %737 = vpow2.f32 %v409_v27 }
 0x1bd   : > { %739 = vpow2.f32 %v387_v29 }
 0x1be   : > { %741 = vpow2.f32 %v389_v30 }
 0x1c2   : > { %v738_v28 = vpop.eup %737 }
 0x1c3   : > { %413 = vadd.xlane.f32.xlu2 %v738_v28  ;;  %v740_v31 = vpop.eup %739 }
 0x1c4   : > { %v393_v33 = vmul.f32 %v740_v31, %v391_v32  ;;  %v742_v36 = vpop.eup %741 }
 0x1c5   : > { %v394_v38 = vmul.f32 %v742_v36, %v392_v37 }
 0x22e   : > { %v412_v34 = vpop.xlane.xlu2 %411 }
 0x22f   : > { %v415_v35 = vadd.f32 %v412_v34, %v393_v33 }
 0x231   : > { %418 = vst.msk [vmem:[#allocation3] sm:$0xff] %vm417_vm2, %v415_v35 }
 0x235   : > { %425 = sbr.rel (%p633_p6) target bundleno = 589 (0x24d), region = 52 }
 0x236   : > { %v414_v39 = vpop.xlane.xlu2 %413 }
 0x237   : > { %v416_v40 = vadd.f32 %v414_v39, %v394_v38 }
 0x239   : > { %419 = vst.msk [vmem:[#allocation3 + $0x8] sm:$0xff] %vm417_vm2, %v416_v40 }
 0x23a   : > { %v428_v41 = vld [vmem:[#allocation3] sm:$0xff]  ;;  %v426_v44 = vld [vmem:[#allocation2] sm:$0xff]  ;;  %v427_v47 = vld [vmem:[#allocation2 + $0x8] sm:$0xff] }
 0x23b   : > { %743 = vlog2.f32 %v428_v41 }
 0x240   : > { %v429_v42 = vld [vmem:[#allocation3 + $0x8] sm:$0xff] }
 0x241   : > { %745 = vlog2.f32 %v429_v42  ;;  %v744_v43 = vpop.eup %743 }
 0x242   : > { %v431_v46 = vmul.f32 0.6931472, %v744_v43 }
 0x244   : > { %v434_v49 = vadd.f32 %v431_v46, %v426_v44 }
 0x246   : > { %436 = vst.msk [vmem:[%s1158_s4] sm:$0xff] %vm417_vm2, %v434_v49 }
 0x247   : > { %v746_v45 = vpop.eup %745 }
 0x248   : > { %v433_v48 = vmul.f32 0.6931472, %v746_v45 }
 0x24a   : > { %v435_v50 = vadd.f32 %v433_v48, %v427_v47 }
 0x24c   : > { %437 = vst.msk [vmem:[%s1158_s4 + $0x8] sm:$0xff] %vm417_vm2, %v435_v50 }
 0x24d PF: > { %s635_s8 = sshll.u32 %s915_s18, 3  ;;  %s458_s30 = sshll.u32 %s1098_s14, 4  ;;  %s459_s30 = int_to_ptr.vmem [resolvable:$true] %s458_s30 }
 0x24e   : > { %s457_s29 = scalar_lea.hbm %s1157_s3, %s635_s8  ;;  %s439_s9 = scalar_lea.sflag [#allocation6], %s1089_s7 }
 0x24f   : > { %s460_s26 = sshll.u32 %s457_s29, 4  ;;  %s857_s18 = scalar_lea.hbm %s1157_s3, 48  ;;  %s461_s26 = int_to_ptr.hbm [resolvable:$true] %s460_s26 }
 0x250   : > { %s851_s0 = sshra.s32 %s461_s26, 4  ;;  %s852_s0 = int_to_ptr.hbm [resolvable:$true] %s851_s0 }
 0x251   : > { %s853_s10 = scalar_lea.hbm %s852_s0, 16  ;;  %p858_p10 = scmp.lt.s32.totalorder %s852_s0, %s1157_s3 }
 0x252   : > { %p854_p7 = scmp.ne.s32.totalorder %s852_s0, %s853_s10  ;;  %p859_p11 = scmp.lt.s32.totalorder %s857_s18, %s853_s10 }
 0x254   : > { %p855_p8 = pnand %p854_p7, %p1049_p13  ;;  %p860_p12 = por %p859_p11, %p858_p10 }
 0x256   : > { %p856_p9 = pneg %p855_p8 }
 0x258   : > { %p861_p2 = pnand %p860_p12, %p856_p9 }
 0x25a   : > { %864 = shalt.err (!%p861_p2)
}
 0x25b   : > { %s932_s7 = smov 128   ;;  %s933_s14 = smov 384  }
 0x25c   : > { %s934_s5 = smov 8  }
 0x25d   : > { %653 = dma.vmem_to_hbm [thread:$0]  (%p1049_p13), %s459_s30, 256, %s461_s26, %s439_s9, %s932_s7, %s933_s14, %s934_s5  }
 0x25e PF: > { %p673_p3 = scmp.ge.s32.totalorder %s923_s20, 2  ;;  %s487_s6 = sand.u32 1, %s903_s15  }
 0x25f   : > { %s488_s8 = scalar_lea.sflag [#allocation6], %s487_s6 }
 0x260   : > { %p667_p1 = pnand %p673_p3, %p1053_p0 }
 0x262   : > { %p668_p4 = pneg %p667_p1 }
 0x264   : > { %898 = dma.done.wait (%p668_p4), %s488_s8, 256  }
 0x265   : > { %900 = vsyncadd (%p668_p4), %s488_s8, 4294967040  ;;  %s22_s20 = sadd.s32 1, %s923_s20   ;;  %s1169_s15 = smov %s907_s16 }
 0x266   : > { %p19_p5 = scmp.ge.s32.totalorder %s22_s20, 5   ;;  %s1170_s16 = smov %s911_s17 }
 0x267   : > { %s1171_s17 = smov %s1010_s27  ;;  %s1172_s18 = smov %s919_s19 }
 0x268   : > { %s1173_s19 = smov %s1175_s21  ;;  %21 = sbr.rel (!%p19_p5) target bundleno = 9 (0x9), region = 114 }
 0x26d   :  { %494 = vsyncpa [#allocation5], 1 }
 0x26e   :  { %496 = vsyncpa [#allocation5 + $0x1], 1 }
 0x26f   :  { %497 = vsyncpa [#allocation8], 1 }
 0x270   :  { %499 = vsyncpa [#allocation8 + $0x1], 1 }
 0x271   :  { %500 = vsyncpa [#allocation6], 1 }
 0x272   :  { %502 = vsyncpa [#allocation6 + $0x1], 1 }

</bundles_post_ra>
